<compile_context>
chip_gen: v6e
topology: v6e:2x2x1
jax: 0.10.0
libtpu: 0.0.40
codegen_flags: <defaults>
</compile_context>

<pallas_src>
import functools

import numpy as np
import jax
import jax.numpy as jnp
from jax.experimental import pallas as pl
from jax.experimental.pallas import tpu as pltpu


def _fused_decoder_kernel(x_ref, m0_ref, b0_ref, m1_ref, b1_ref, o_ref):
    """Whole decoder for the whole batch, entirely VMEM-resident.

    x_ref : (B, Cin*Lin)        flattened NCL input
    m0_ref: (Cin*Lin, C0*L0)    folded upsample+conv operator, block 0
    b0_ref: (1, C0*L0)          bias broadcast over positions, block 0
    m1_ref: (C0*L0, C1*L1)      folded upsample+conv operator, block 1
    b1_ref: (1, C1*L1)          bias broadcast over positions, block 1
    o_ref : (B, C1*L1)          flattened NCL output
    """
    h = jnp.dot(x_ref[...], m0_ref[...], preferred_element_type=jnp.float32)
    h = jnp.maximum(h + b0_ref[...], 0.0)                        # ReLU
    y = jnp.dot(h, m1_ref[...], preferred_element_type=jnp.float32)
    o_ref[...] = jax.nn.sigmoid(y + b1_ref[...]).astype(o_ref.dtype)


def fold_upsample_conv(w_oik, length_in, *, scale=2, padding=1, stride=1,
                       dilation=1):
    """Fold nearest-upsample(scale) -> Conv1d(k, stride=1, pad) into a dense map.

    w_oik: (Cout, Cin, K) PyTorch nn.Conv1d weight (cross-correlation).
    Returns (M, L_out) with M: (Cin*L_in, Cout*L_out) such that for x (Cin, L_in):
      conv1d(upsample_nearest(x, scale), w, padding).reshape(-1)
        == x.reshape(-1) @ M
    """
    assert stride == 1 and dilation == 1
    w = np.asarray(w_oik, dtype=np.float32)
    c_out, c_in, k = w.shape
    l_up = length_in * scale
    l_out = l_up + 2 * padding - k + 1
    m = np.zeros((c_in, length_in, c_out, l_out), np.float32)
    for o in range(c_out):
        for c in range(c_in):
            for t in range(k):
                for i in range(l_out):
                    j = i - padding + t            # tap position in upsampled seq
                    if 0 <= j < l_up:              # zero padding otherwise
                        m[c, j // scale, o, i] += w[o, c, t]   # nearest upsample
    return jnp.asarray(m.reshape(c_in * length_in, c_out * l_out)), int(l_out)


def prepare_decoder_params(w0_oik, b0, w1_oik, b1, input_dim):
    """One-time weight preprocessing (akin to folding BN into conv weights)."""
    c_in, l_in = input_dim
    m0, l0 = fold_upsample_conv(w0_oik, l_in)
    m1, l1 = fold_upsample_conv(w1_oik, l0)
    c1 = int(w1_oik.shape[0])
    params = {
        'm0': m0,
        'b0_row': jnp.repeat(jnp.asarray(b0, jnp.float32), l0)[None, :],
        'm1': m1,
        'b1_row': jnp.repeat(jnp.asarray(b1, jnp.float32), l1)[None, :],
    }
    return params, (c1, l1)


@functools.partial(jax.jit, static_argnames=('c_out', 'l_out'))
def conv_decoder_forward(x_ncl, m0, b0_row, m1, b1_row, *, c_out, l_out):
    """Pallas implementation of ConvDecoder.forward for the config above."""
    batch, c_in, l_in = x_ncl.shape
    x_flat = x_ncl.reshape(batch, c_in * l_in)        # zero-copy row-major reshape
    vmem = pl.BlockSpec(memory_space=pltpu.MemorySpace.VMEM)
    out_flat = pl.pallas_call(
        _fused_decoder_kernel,
        out_shape=jax.ShapeDtypeStruct((batch, c_out * l_out), x_ncl.dtype),
        in_specs=[vmem, vmem, vmem, vmem, vmem],
        out_specs=vmem,
    )(x_flat, m0, b0_row, m1, b1_row)
    return out_flat.reshape(batch, c_out, l_out)      # zero-copy row-major reshape


# ----------------------------- pure-JAX reference ----------------------------
def _ref_forward(x_ncl, w0_oik, b0, w1_oik, b1):
    def up(x):
        return jnp.repeat(x, 2, axis=2)

    def conv(x, w, b):
        y = jax.lax.conv_general_dilated(
            x, w, window_strides=(1,), padding=((1, 1),),
            dimension_numbers=('NCH', 'OIH', 'NCH'))
        return y + b[None, :, None]

    x = jnp.maximum(conv(up(x_ncl), w0_oik, b0), 0.0)
    return jax.nn.sigmoid(conv(up(x), w1_oik, b1))


if __name__ == "__main__":
    key = jax.random.PRNGKey(0)
    kx, kw0, kb0, kw1, kb1 = jax.random.split(key, 5)

    B, C_in, L_in = 2, 4, 16
    channels = [8, 4]
    x = jax.random.normal(kx, (B, C_in, L_in), jnp.float32)   # PyTorch NCL

    def conv_init(kw, kb, cin, cout, k=3):
        # deterministic init mimicking nn.Conv1d default uniform bounds
        bound = 1.0 / (cin * k) ** 0.5
        w = jax.random.uniform(kw, (cout, cin, k), jnp.float32, -bound, bound)
        b = jax.random.uniform(kb, (cout,), jnp.float32, -bound, bound)
        return w, b

    w0_oik, b0 = conv_init(kw0, kb0, C_in, channels[0])
    w1_oik, b1 = conv_init(kw1, kb1, channels[0], channels[1])

    params, (c_out, l_out) = prepare_decoder_params(
        w0_oik, b0, w1_oik, b1, (C_in, L_in))

    out = conv_decoder_forward(x, params['m0'], params['b0_row'],
                               params['m1'], params['b1_row'],
                               c_out=c_out, l_out=l_out)
    out = jax.block_until_ready(out)

    ref = _ref_forward(x, w0_oik, b0, w1_oik, b1)
    assert out.shape == (B, channels[-1], 4 * L_in), out.shape
    max_err = float(jnp.max(jnp.abs(out - ref)))
    assert jnp.allclose(out, ref, atol=2e-5, rtol=1e-5), max_err

    print("KERNEL_OK")
</pallas_src>

<mosaic_0001>
module attributes {stable_mosaic.version = 11 : i64} {
  func.func @_fused_decoder_kernel(%arg0: memref<2x64xf32, #tpu.memory_space<vmem>>, %arg1: memref<64x256xf32, #tpu.memory_space<vmem>>, %arg2: memref<1x256xf32, #tpu.memory_space<vmem>>, %arg3: memref<256x256xf32, #tpu.memory_space<vmem>>, %arg4: memref<1x256xf32, #tpu.memory_space<vmem>>, %arg5: memref<2x256xf32, #tpu.memory_space<vmem>>) attributes {dimension_semantics = [], scalar_prefetch = 0 : i64, scratch_operands = 0 : i64, tpu.core_type = #tpu.core_type<tc>} {
    %c0 = arith.constant 0 : index
    %c0_0 = arith.constant 0 : index
    %0 = vector.load %arg0[%c0, %c0_0] : memref<2x64xf32, #tpu.memory_space<vmem>>, vector<2x64xf32>
    %c0_1 = arith.constant 0 : index
    %c0_2 = arith.constant 0 : index
    %1 = vector.load %arg1[%c0_1, %c0_2] : memref<64x256xf32, #tpu.memory_space<vmem>>, vector<64x256xf32>
    %cst = arith.constant dense<0.000000e+00> : vector<2x256xf32>
    %2 = tpu.matmul %0, %1, %cst {dimension_numbers = #tpu.dot_dimension_numbers<[1], [0], [0], [1], [0, 0, 1, 1], [], []>} : vector<2x64xf32>, vector<64x256xf32>, vector<2x256xf32> -> vector<2x256xf32>
    %c0_3 = arith.constant 0 : index
    %c0_4 = arith.constant 0 : index
    %3 = vector.load %arg2[%c0_3, %c0_4] : memref<1x256xf32, #tpu.memory_space<vmem>>, vector<1x256xf32>
    %4 = vector.broadcast %3 : vector<1x256xf32> to vector<2x256xf32>
    %5 = arith.addf %2, %4 : vector<2x256xf32>
    %cst_5 = arith.constant 0.000000e+00 : f32
    %6 = vector.broadcast %cst_5 : f32 to vector<2x256xf32>
    %7 = arith.maximumf %5, %6 : vector<2x256xf32>
    %c0_6 = arith.constant 0 : index
    %c0_7 = arith.constant 0 : index
    %8 = vector.load %arg3[%c0_6, %c0_7] : memref<256x256xf32, #tpu.memory_space<vmem>>, vector<256x256xf32>
    %cst_8 = arith.constant dense<0.000000e+00> : vector<2x256xf32>
    %9 = tpu.matmul %7, %8, %cst_8 {dimension_numbers = #tpu.dot_dimension_numbers<[1], [0], [0], [1], [0, 0, 1, 1], [], []>} : vector<2x256xf32>, vector<256x256xf32>, vector<2x256xf32> -> vector<2x256xf32>
    %c0_9 = arith.constant 0 : index
    %c0_10 = arith.constant 0 : index
    %10 = vector.load %arg4[%c0_9, %c0_10] : memref<1x256xf32, #tpu.memory_space<vmem>>, vector<1x256xf32>
    %11 = vector.broadcast %10 : vector<1x256xf32> to vector<2x256xf32>
    %12 = arith.addf %9, %11 : vector<2x256xf32>
    %13 = arith.negf %12 : vector<2x256xf32>
    %14 = math.exp %13 : vector<2x256xf32>
    %cst_11 = arith.constant 1.000000e+00 : f32
    %15 = vector.broadcast %cst_11 : f32 to vector<2x256xf32>
    %16 = arith.addf %15, %14 : vector<2x256xf32>
    %17 = arith.divf %15, %16 : vector<2x256xf32>
    %c0_12 = arith.constant 0 : index
    %c0_13 = arith.constant 0 : index
    %18 = vector.load %arg5[%c0_12, %c0_13] : memref<2x256xf32, #tpu.memory_space<vmem>>, vector<2x256xf32>
    tpu.vector_store %arg5[%c0_12, %c0_13], %17 {strides = array<i32>} : memref<2x256xf32, #tpu.memory_space<vmem>>, vector<2x256xf32>,
    return
  }
}

</mosaic_0001>

<bundles_post_ra>
// kernel: conv_decoder_forward.1
= control target key start
LH: loop header
LB: loop body
LE: loop exit
PB: predicated region body
PF: predicated region fallthrough
CT: control target
= control target key end

     0   :  { %10 = vsyncpa [#allocation3], 0  ;;  %s445_s0 = inlined_call_operand.vmem [shape: f32[2,64], index: 0, kind: input, shape index: {}]   ;;  %s446_s1 = inlined_call_operand.hbm [shape: f32[64,256], index: 1, kind: input, shape index: {}]   ;;  %s447_s2 = inlined_call_operand.vmem [shape: f32[1,256], index: 2, kind: input, shape index: {}]   ;;  %s448_s3 = inlined_call_operand.hbm [shape: f32[256,256], index: 3, kind: input, shape index: {}]   ;;  %s449_s4 = inlined_call_operand.vmem [shape: f32[1,256], index: 4, kind: input, shape index: {}]   ;;  %s450_s5 = inlined_call_operand.vmem [shape: f32[2,256], index: 5, kind: output, shape index: {}]  }
   0x1   :  { %11 = vsyncpa [#allocation5], 0  ;;  %s392_s18 = smov [#allocation2]  }
   0x2   :  { %s19_s19 = sshll.u32 %s392_s18, 4  ;;  %s20_s19 = int_to_ptr.vmem [resolvable:$true] %s19_s19 }
   0x3   :  { %s356_s20 = scalar_lea.vmem %s20_s19, 2048  ;;  %p361_p1 = scmp.lt.s32.totalorder %s20_s19, %s20_s19 }
   0x4   :  { %p357_p0 = scmp.ne.s32.totalorder %s20_s19, %s356_s20  ;;  %p362_p2 = scmp.lt.s32.totalorder %s356_s20, %s356_s20 }
   0x6   :  { %p363_p3 = por %p362_p2, %p361_p1 }
   0x8   :  { %p364_p4 = pnand %p363_p3, %p357_p0 }
   0xa   :  { %367 = shalt.err (!%p364_p4)
}
   0xb   :  { %s393_s21 = smov 256   ;;  %s394_s22 = smov 16  }
   0xc   :  { %25 = dma.hbm_to_vmem [thread:$0]  %s446_s1, 2048, %s20_s19, [#allocation3], %s393_s21, %s393_s21, %s394_s22  }
   0xd   :  { %s395_s25 = smov [#allocation4]  }
   0xe   :  { %s33_s26 = sshll.u32 %s395_s25, 4  ;;  %s34_s26 = int_to_ptr.vmem [resolvable:$true] %s33_s26 }
   0xf   :  { %s376_s27 = scalar_lea.vmem %s34_s26, 8192  ;;  %p381_p6 = scmp.lt.s32.totalorder %s34_s26, %s34_s26 }
  0x10   :  { %p377_p5 = scmp.ne.s32.totalorder %s34_s26, %s376_s27  ;;  %p382_p7 = scmp.lt.s32.totalorder %s376_s27, %s376_s27 }
  0x12   :  { %p383_p8 = por %p382_p7, %p381_p6 }
  0x14   :  { %p384_p9 = pnand %p383_p8, %p377_p5 }
  0x16   :  { %387 = shalt.err (!%p384_p9)
}
  0x17   :  { %39 = dma.hbm_to_vmem [thread:$0]  %s448_s3, 8192, %s34_s26, [#allocation5], %s393_s21, %s393_s21, %s394_s22  }
  0x18   :  { %388 = dma.done.wait [#allocation3], 2048  }
  0x19   :  { %389 = vsyncadd [#allocation3], 4294965248 }
  0x1a   :  { %390 = dma.done.wait [#allocation5], 8192  }
  0x1b   :  { %391 = vsyncadd [#allocation5], 4294959104  ;;  %v396_v0 = vmov 0.0   ;;  %v64_v1 = vld [vmem:[#allocation2 + $0x78] sm:$0xff]  ;;  %v63_v2 = vld [vmem:[#allocation2 + $0x70] sm:$0xff]  ;;  %vm77_vm0 = vcmask 523264  }
  0x1c   :  { %145 = vmatprep.mubr.f32.mxu0 %v396_v0  ;;  %v62_v3 = vld [vmem:[#allocation2 + $0x68] sm:$0xff]  ;;  %97 = vmatprep.subr.mxu0 %v64_v1  ;;  %v61_v4 = vld [vmem:[#allocation2 + $0x60] sm:$0xff]  ;;  %v60_v5 = vld [vmem:[#allocation2 + $0x58] sm:$0xff] }
  0x1d   :  { %98 = vmatpush1.msra.mxu0 %v63_v2  ;;  %v59_v6 = vld [vmem:[#allocation2 + $0x50] sm:$0xff]  ;;  %v58_v7 = vld [vmem:[#allocation2 + $0x48] sm:$0xff]  ;;  %v57_v8 = vld [vmem:[#allocation2 + $0x40] sm:$0xff] }
  0x1e   :  { %99 = vmatprep.subr.mxu0 %v62_v3  ;;  %v56_v9 = vld [vmem:[#allocation2 + $0x38] sm:$0xff]  ;;  %v184_v11 = vld [vmem:[#allocation4 + $0xf0] sm:$0xff]  ;;  %v183_v12 = vld [vmem:[#allocation4 + $0xe8] sm:$0xff] }
  0x1f   :  { %100 = vmatpush1.msra.mxu0 %v61_v4  ;;  %v185_v10 = vld [vmem:[#allocation4 + $0xf8] sm:$0xff]  ;;  %v182_v13 = vld [vmem:[#allocation4 + $0xe0] sm:$0xff]  ;;  %v55_v14 = vld [vmem:[#allocation2 + $0x30] sm:$0xff] }
  0x20   :  { %101 = vmatprep.subr.mxu0 %v60_v5  ;;  %230 = vmatprep.subr.mxu1 %v185_v10  ;;  %v181_v15 = vld [vmem:[#allocation4 + $0xd8] sm:$0xff]  ;;  %v54_v16 = vld [vmem:[#allocation2 + $0x28] sm:$0xff]  ;;  %v180_v17 = vld [vmem:[#allocation4 + $0xd0] sm:$0xff] }
  0x21   :  { %102 = vmatpush1.msra.mxu0 %v59_v6  ;;  %231 = vmatpush1.msra.mxu1 %v184_v11  ;;  %v53_v18 = vld [vmem:[#allocation2 + $0x20] sm:$0xff]  ;;  %v179_v19 = vld [vmem:[#allocation4 + $0xc8] sm:$0xff]  ;;  %v52_v20 = vld [vmem:[#allocation2 + $0x18] sm:$0xff] }
  0x22   :  { %103 = vmatprep.subr.mxu0 %v58_v7  ;;  %232 = vmatprep.subr.mxu1 %v183_v12  ;;  %v178_v21 = vld [vmem:[#allocation4 + $0xc0] sm:$0xff]  ;;  %v51_v22 = vld [vmem:[#allocation2 + $0x10] sm:$0xff]  ;;  %v177_v23 = vld [vmem:[#allocation4 + $0xb8] sm:$0xff] }
  0x23   :  { %104 = vmatpush1.msra.mxu0 %v57_v8  ;;  %233 = vmatpush1.msra.mxu1 %v182_v13  ;;  %v50_v24 = vld [vmem:[#allocation2 + $0x8] sm:$0xff]  ;;  %v176_v25 = vld [vmem:[#allocation4 + $0xb0] sm:$0xff]  ;;  %v49_v26 = vld [vmem:[#allocation2] sm:$0xff] }
  0x24   :  { %105 = vmatprep.subr.mxu0 %v56_v9  ;;  %234 = vmatprep.subr.mxu1 %v181_v15  ;;  %v175_v27 = vld [vmem:[#allocation4 + $0xa8] sm:$0xff]  ;;  %v48_v28 = vld [vmem:[%s445_s0] sm:$0x3]  ;;  %v173_v30 = vld [vmem:[#allocation4 + $0x98] sm:$0xff] }
  0x25   :  { %106 = vmatpush1.msra.mxu0 %v55_v14  ;;  %235 = vmatpush1.msra.mxu1 %v180_v17  ;;  %v174_v29 = vld [vmem:[#allocation4 + $0xa0] sm:$0xff]  ;;  %v172_v31 = vld [vmem:[#allocation4 + $0x90] sm:$0xff]  ;;  %v171_v32 = vld [vmem:[#allocation4 + $0x88] sm:$0xff] }
  0x26   :  { %107 = vmatprep.subr.mxu0 %v54_v16  ;;  %236 = vmatprep.subr.mxu1 %v179_v19  ;;  %v170_v33 = vld [vmem:[#allocation4 + $0x80] sm:$0xff]  ;;  %v169_v34 = vld [vmem:[#allocation4 + $0x78] sm:$0xff]  ;;  %v168_v35 = vld [vmem:[#allocation4 + $0x70] sm:$0xff] }
  0x27   :  { %108 = vmatpush1.msra.mxu0 %v53_v18  ;;  %237 = vmatpush1.msra.mxu1 %v178_v21  ;;  %v167_v36 = vld [vmem:[#allocation4 + $0x68] sm:$0xff]  ;;  %v166_v37 = vld [vmem:[#allocation4 + $0x60] sm:$0xff]  ;;  %v165_v38 = vld [vmem:[#allocation4 + $0x58] sm:$0xff]  ;;  %v67_v18 = vlaneseq }
  0x28   :  { %109 = vmatprep.subr.mxu0 %v52_v20  ;;  %238 = vmatprep.subr.mxu1 %v177_v23  ;;  %v164_v39 = vld [vmem:[#allocation4 + $0x50] sm:$0xff]  ;;  %v163_v40 = vld [vmem:[#allocation4 + $0x48] sm:$0xff]  ;;  %v162_v41 = vld [vmem:[#allocation4 + $0x40] sm:$0xff] }
  0x29   :  { %110 = vmatpush1.msra.mxu0 %v51_v22  ;;  %239 = vmatpush1.msra.mxu1 %v176_v25  ;;  %v161_v42 = vld [vmem:[#allocation4 + $0x38] sm:$0xff]  ;;  %v160_v43 = vld [vmem:[#allocation4 + $0x30] sm:$0xff]  ;;  %v159_v44 = vld [vmem:[#allocation4 + $0x28] sm:$0xff]  ;;  %v68_v19 = vshrl.u32 %v67_v18, 7 }
  0x2a   :  { %111 = vmatprep.subr.mxu0 %v50_v24  ;;  %240 = vmatprep.subr.mxu1 %v175_v27  ;;  %v158_v45 = vld [vmem:[#allocation4 + $0x20] sm:$0xff]  ;;  %v157_v46 = vld [vmem:[#allocation4 + $0x18] sm:$0xff]  ;;  %v156_v47 = vld [vmem:[#allocation4 + $0x10] sm:$0xff] }
  0x2b   :  { %112 = vmatpush1.msra.mxu0 %v49_v26  ;;  %241 = vmatpush1.msra.mxu1 %v174_v29  ;;  %v155_v48 = vld [vmem:[#allocation4 + $0x8] sm:$0xff]  ;;  %v154_v49 = vld [vmem:[#allocation4] sm:$0xff]  ;;  %v217_v50 = vld [vmem:[#allocation4 + $0x1f8] sm:$0xff]  ;;  %v69_v20 = vsub.s32 0, %v68_v19  ;;  %v73_v22 = vsub.s32 1, %v68_v19 }
  0x2c   :  { %331 = vmatmul.mubr.msk.f32.vlgmr.msra.gmra.mxu0 %vm77_vm0, %v48_v28  ;;  %242 = vmatprep.subr.mxu1 %v173_v30  ;;  %v216_v51 = vld [vmem:[#allocation4 + $0x1f0] sm:$0xff]  ;;  %v215_v52 = vld [vmem:[#allocation4 + $0x1e8] sm:$0xff]  ;;  %v214_v53 = vld [vmem:[#allocation4 + $0x1e0] sm:$0xff] }
  0x2d   :  { %243 = vmatpush1.msra.mxu1 %v172_v31  ;;  %v213_v54 = vld [vmem:[#allocation4 + $0x1d8] sm:$0xff]  ;;  %v212_v55 = vld [vmem:[#allocation4 + $0x1d0] sm:$0xff]  ;;  %v211_v56 = vld [vmem:[#allocation4 + $0x1c8] sm:$0xff] }
  0x2e   :  { %244 = vmatprep.subr.mxu1 %v171_v32  ;;  %v210_v57 = vld [vmem:[#allocation4 + $0x1c0] sm:$0xff]  ;;  %v209_v58 = vld [vmem:[#allocation4 + $0x1b8] sm:$0xff]  ;;  %v208_v59 = vld [vmem:[#allocation4 + $0x1b0] sm:$0xff] }
  0x2f   :  { %245 = vmatpush1.msra.mxu1 %v170_v33  ;;  %v207_v60 = vld [vmem:[#allocation4 + $0x1a8] sm:$0xff]  ;;  %v206_v61 = vld [vmem:[#allocation4 + $0x1a0] sm:$0xff]  ;;  %v205_v62 = vld [vmem:[#allocation4 + $0x198] sm:$0xff] }
  0x30   :  { %246 = vmatprep.subr.mxu1 %v169_v34  ;;  %v204_v63 = vld [vmem:[#allocation4 + $0x190] sm:$0xff]  ;;  %v203_v0 = vld [vmem:[#allocation4 + $0x188] sm:$0xff]  ;;  %v202_v1 = vld [vmem:[#allocation4 + $0x180] sm:$0xff] }
  0x31   :  { %247 = vmatpush1.msra.mxu1 %v168_v35  ;;  %v201_v2 = vld [vmem:[#allocation4 + $0x178] sm:$0xff]  ;;  %v200_v3 = vld [vmem:[#allocation4 + $0x170] sm:$0xff]  ;;  %v199_v4 = vld [vmem:[#allocation4 + $0x168] sm:$0xff] }
  0x32   :  { %248 = vmatprep.subr.mxu1 %v167_v36  ;;  %v198_v5 = vld [vmem:[#allocation4 + $0x160] sm:$0xff]  ;;  %v197_v6 = vld [vmem:[#allocation4 + $0x158] sm:$0xff]  ;;  %v196_v7 = vld [vmem:[#allocation4 + $0x150] sm:$0xff] }
  0x33   :  { %249 = vmatpush1.msra.mxu1 %v166_v37  ;;  %v195_v8 = vld [vmem:[#allocation4 + $0x148] sm:$0xff]  ;;  %v194_v9 = vld [vmem:[#allocation4 + $0x140] sm:$0xff]  ;;  %v193_v10 = vld [vmem:[#allocation4 + $0x138] sm:$0xff] }
  0x34   :  { %250 = vmatprep.subr.mxu1 %v165_v38  ;;  %v192_v11 = vld [vmem:[#allocation4 + $0x130] sm:$0xff]  ;;  %v191_v12 = vld [vmem:[#allocation4 + $0x128] sm:$0xff]  ;;  %v190_v13 = vld [vmem:[#allocation4 + $0x120] sm:$0xff] }
  0x35   :  { %251 = vmatpush1.msra.mxu1 %v164_v39  ;;  %v189_v14 = vld [vmem:[#allocation4 + $0x118] sm:$0xff]  ;;  %v188_v15 = vld [vmem:[#allocation4 + $0x110] sm:$0xff]  ;;  %v187_v16 = vld [vmem:[#allocation4 + $0x108] sm:$0xff] }
  0x36   :  { %252 = vmatprep.subr.mxu1 %v163_v40  ;;  %v186_v17 = vld [vmem:[#allocation4 + $0x100] sm:$0xff] }
  0x37   :  { %253 = vmatpush1.msra.mxu1 %v162_v41  ;;  %v65_v21 = vld [vmem:[%s447_s2] sm:$0x3] }
  0x38   :  { %254 = vmatprep.subr.mxu1 %v161_v42  ;;  %v70_v23 = vrot.slane %v65_v21, %v69_v20  ;;  %v74_v24 = vrot.slane %v65_v21, %v73_v22  ;;  %v218_v31 = vld [vmem:[%s449_s4] sm:$0x3] }
  0x39   :  { %255 = vmatpush1.msra.mxu1 %v160_v43  ;;  %v223_v32 = vrot.slane %v218_v31, %v69_v20  ;;  %v227_v33 = vrot.slane %v218_v31, %v73_v22 }
  0x3a   :  { %256 = vmatprep.subr.mxu1 %v159_v44 }
  0x3b   :  { %257 = vmatpush1.msra.mxu1 %v158_v45 }
  0x3c   :  { %258 = vmatprep.subr.mxu1 %v157_v46 }
  0x3d   :  { %259 = vmatpush1.msra.mxu1 %v156_v47 }
  0x3e   :  { %260 = vmatprep.subr.mxu1 %v155_v48 }
  0x3f   :  { %261 = vmatpush1.msra.mxu1 %v154_v49 }
  0x40   :  { %262 = vmatprep.subr.mxu1 %v217_v50 }
  0x41   :  { %263 = vmatpush2.msra.mxu1 %v216_v51 }
  0x42   :  { %264 = vmatprep.subr.mxu1 %v215_v52 }
  0x43   :  { %265 = vmatpush2.msra.mxu1 %v214_v53 }
  0x44   :  { %266 = vmatprep.subr.mxu1 %v213_v54 }
  0x45   :  { %267 = vmatpush2.msra.mxu1 %v212_v55 }
  0x46   :  { %268 = vmatprep.subr.mxu1 %v211_v56 }
  0x47   :  { %269 = vmatpush2.msra.mxu1 %v210_v57 }
  0x48   :  { %270 = vmatprep.subr.mxu1 %v209_v58 }
  0x49   :  { %271 = vmatpush2.msra.mxu1 %v208_v59 }
  0x4a   :  { %272 = vmatprep.subr.mxu1 %v207_v60 }
  0x4b   :  { %273 = vmatpush2.msra.mxu1 %v206_v61 }
  0x4c   :  { %274 = vmatprep.subr.mxu1 %v205_v62 }
  0x4d   :  { %275 = vmatpush2.msra.mxu1 %v204_v63 }
  0x4e   :  { %276 = vmatprep.subr.mxu1 %v203_v0 }
  0x4f   :  { %277 = vmatpush2.msra.mxu1 %v202_v1 }
  0x50   :  { %278 = vmatprep.subr.mxu1 %v201_v2 }
  0x51   :  { %279 = vmatpush2.msra.mxu1 %v200_v3 }
  0x52   :  { %280 = vmatprep.subr.mxu1 %v199_v4 }
  0x53   :  { %281 = vmatpush2.msra.mxu1 %v198_v5 }
  0x54   :  { %282 = vmatprep.subr.mxu1 %v197_v6 }
  0x55   :  { %283 = vmatpush2.msra.mxu1 %v196_v7 }
  0x56   :  { %284 = vmatprep.subr.mxu1 %v195_v8 }
  0x57   :  { %285 = vmatpush2.msra.mxu1 %v194_v9 }
  0x58   :  { %286 = vmatprep.subr.mxu1 %v193_v10 }
  0x59   :  { %287 = vmatpush2.msra.mxu1 %v192_v11 }
  0x5a   :  { %288 = vmatprep.subr.mxu1 %v191_v12 }
  0x5b   :  { %289 = vmatpush2.msra.mxu1 %v190_v13 }
  0x5c   :  { %290 = vmatprep.subr.mxu1 %v189_v14 }
  0x5d   :  { %291 = vmatpush2.msra.mxu1 %v188_v15 }
  0x5e   :  { %292 = vmatprep.subr.mxu1 %v187_v16 }
  0x5f   :  { %293 = vmatpush2.msra.mxu1 %v186_v17 }
  0xec   :  { %v147_v25 = vpop.f32.mrf.mxu0 }
  0xed   :  { %v148_v26 = vadd.f32 %v147_v25, %v70_v23 }
  0xee   :  { %v149_v27 = vpop.f32.mrf.mxu0 }
  0xef   :  { %v150_v28 = vadd.f32 %v149_v27, %v74_v24  ;;  %v152_v30 = vmax.f32 %v148_v26, 0.0 }
  0xf1   :  { %v153_v29 = vmax.f32 %v150_v28, 0.0 }
  0xf3   :  { %294 = vmatprep.mubr.f32.mxu1 %v153_v29 }
  0xf4   :  { %295 = vmatmul.mubr.f32.vlgmr.msra.gmra.mxu1 %v152_v30 }
 0x1b4   :  { %v296_v34 = vpop.f32.mrf.mxu1 }
 0x1b5   :  { %v297_v35 = vadd.f32 %v296_v34, %v223_v32 }
 0x1b6   :  { %v298_v36 = vpop.f32.mrf.mxu1 }
 0x1b7   :  { %v332_v37 = vmul.f32 -1.442695, %v297_v35  ;;  %v299_v38 = vadd.f32 %v298_v36, %v227_v33 }
 0x1b9   :  { %340 = vpow2.f32 %v332_v37  ;;  %v333_v39 = vmul.f32 -1.442695, %v299_v38 }
 0x1bb   :  { %342 = vpow2.f32 %v333_v39 }
 0x1c6   :  { %v341_v40 = vpop.eup %340 }
 0x1c7   :  { %v307_v41 = vadd.f32 1.0, %v341_v40 }
 0x1c8   :  { %v343_v42 = vpop.eup %342 }
 0x1c9   :  { %v308_v43 = vadd.f32 1.0, %v343_v42  ;;  %344 = vrcp.f32 %v307_v41 }
 0x1cb   :  { %346 = vrcp.f32 %v308_v43 }
 0x1d6   :  { %v345_v44 = vpop.eup %344 }
 0x1d8   :  { %v347_v45 = vpop.eup %346 }
 0x1d9   :  { %v315_v46 = vcombine.low %v345_v44, %v347_v45 }
 0x1db   :  { %334 = vst.sshfl [vmem:[%s450_s5] sm:$0x33 pattern:$0x76325410] %v315_v46 }
 0x1dc   :  { %329 = vsyncpa [#allocation3], 1 }
 0x1dd   :  { %330 = vsyncpa [#allocation5], 1 }

</bundles_post_ra>
